<compile_context>
chip_gen: v5e
topology: v5e:2x2
jax: 0.10.0
libtpu: 0.0.40
codegen_flags: <defaults>
</compile_context>

<pallas_src>
import math

import jax
import jax.numpy as jnp
from jax.experimental import pallas as pl
from jax.experimental.pallas import tpu as pltpu

_LANE = 128                      # TPU lane width (last block dim)
_TARGET_STEPS = 8                # aim for >=8 tiles: pipelining + 2 TCs on v7x
_MIN_BLOCK_BYTES = 256 * 1024    # don't shatter small tensors into micro-steps
_VMEM_LIMIT_BYTES = 32 * 1024 * 1024  # <= physical VMEM on every generation


def _cdiv(a, b):
    return -(-a // b)


def _round_up(a, b):
    return _cdiv(a, b) * b


def _sublane(dtype):
    # Full-vreg sublane quantum: 8 rows for 4-byte, 16 for 2-byte, 32 for 1-byte.
    return max(8, 32 // jnp.dtype(dtype).itemsize)


def _vmem_budget_bytes():
    # Double-buffered working-set budget. The conservative default fits the
    # scoped-VMEM defaults everywhere (v5e 16 MiB, v6e/v7x 32 MiB); chips with
    # 128 MiB physical VMEM (v5e/v6e) get a little more headroom.
    cap = None
    try:
        cap = pltpu.get_tpu_info().vmem_capacity_bytes
    except Exception:
        cap = None
    if cap is not None and cap >= 128 * 1024 * 1024:
        return 20 * 1024 * 1024
    return 12 * 1024 * 1024


def _multiplied_kernel(x_ref, w_ref, o_ref):
    # sigmoid lowers to the EUP (its own issue slot); the multiply runs on the
    # VPU. The weight tile is loaded & sigmoid'd once per tile and broadcast
    # over the batch dim of the x tile. The kernel is HBM-bandwidth bound.
    gate = jax.nn.sigmoid(w_ref[...])
    o_ref[...] = (x_ref[...] * gate).astype(o_ref.dtype)


def multiplied_layer(x, weight):
    """x: (B, *shape); weight: shape. Returns x * sigmoid(weight) (broadcast over B)."""
    B = x.shape[0]
    assert x.shape[1:] == weight.shape, (x.shape, weight.shape)
    flat = math.prod(weight.shape)

    out_dtype = jnp.promote_types(x.dtype, weight.dtype)
    isz_x = jnp.dtype(x.dtype).itemsize
    isz_w = jnp.dtype(weight.dtype).itemsize
    isz_o = jnp.dtype(out_dtype).itemsize
    q = max(_sublane(x.dtype), _sublane(weight.dtype), _sublane(out_dtype))
    budget = _vmem_budget_bytes()

    compiler_params = pltpu.CompilerParams(
        dimension_semantics=("parallel", "parallel"),
        vmem_limit_bytes=_VMEM_LIMIT_BYTES,
    )

    if flat % _LANE == 0:
        # ---------- aligned fast path: dense (B, R, 128) layout --------------
        R = flat // _LANE

        def rows_fit(tb):
            # double-buffered bytes per row of 128 lanes (x + out per batch elem, + weight)
            per_row = 2 * _LANE * (tb * (isz_x + isz_o) + isz_w)
            return (budget // per_row) // q * q

        TB = B
        if rows_fit(TB) < q:
            # huge batch: tile the batch so a (q, 128) row tile still fits
            # double-buffered (keeps the pipeline alive even on v5e's budget)
            cap = (budget // (2 * _LANE * q) - isz_w) // (isz_x + isz_o)
            TB = max(1, min(B, cap))

        tr_budget = max(q, rows_fit(TB))
        tr_split = _round_up(_cdiv(R, _TARGET_STEPS), q)      # ~8 tiles when big
        tr_min = _round_up(_cdiv(_MIN_BLOCK_BYTES, _LANE * isz_x * TB), q)
        TR = max(q, min(tr_budget, max(tr_split, tr_min)))
        if TR >= R:
            TR = R            # single full-extent block along rows (always legal)

        grid = (_cdiv(R, TR), _cdiv(B, TB))   # batch innermost -> weight tile reused

        x3 = x.reshape(B, R, _LANE)           # contiguous reshape: no HBM copy
        w3 = weight.reshape(R, _LANE)
        out3 = pl.pallas_call(
            _multiplied_kernel,
            out_shape=jax.ShapeDtypeStruct((B, R, _LANE), out_dtype),
            grid=grid,
            in_specs=[
                pl.BlockSpec((TB, TR, _LANE), lambda j, b: (b, j, 0)),
                pl.BlockSpec((TR, _LANE), lambda j, b: (j, 0)),
            ],
            out_specs=pl.BlockSpec((TB, TR, _LANE), lambda j, b: (b, j, 0)),
            compiler_params=compiler_params,
        )(x3, w3)
        return out3.reshape(x.shape)

    # -------- ragged fallback (flat % 128 != 0): no padding, no extra copies --
    # x stays (B, flat); Pallas masks the partial last block along the feature
    # axis, so the only HBM traffic is the kernel's single streaming pass.
    def cols_fit(tb):
        tb_pad = _round_up(tb, q)            # VMEM pads sublanes
        per_col = 2 * (tb_pad * (isz_x + isz_o) + q * isz_w)
        return (budget // per_col) // _LANE * _LANE

    TB = B
    if cols_fit(TB) < _LANE:
        cap = (budget // (2 * _LANE) - q * isz_w) // (isz_x + isz_o)
        TB = max(q, min(B, (cap // q) * q))

    tf_budget = max(_LANE, cols_fit(TB))
    tf_split = _round_up(_cdiv(flat, _TARGET_STEPS), _LANE)
    tf_min = _round_up(_cdiv(_MIN_BLOCK_BYTES, isz_x * TB), _LANE)
    TF = max(_LANE, min(tf_budget, max(tf_split, tf_min)))
    if TF >= flat:
        TF = flat             # single full-extent block (no 128-alignment needed)

    grid = (_cdiv(flat, TF), _cdiv(B, TB))

    x2 = x.reshape(B, flat)                   # contiguous reshape: no HBM copy
    w2 = weight.reshape(1, flat)
    out2 = pl.pallas_call(
        _multiplied_kernel,
        out_shape=jax.ShapeDtypeStruct((B, flat), out_dtype),
        grid=grid,
        in_specs=[
            pl.BlockSpec((TB, TF), lambda j, b: (b, j)),
            pl.BlockSpec((1, TF), lambda j, b: (0, j)),
        ],
        out_specs=pl.BlockSpec((TB, TF), lambda j, b: (b, j)),
        compiler_params=compiler_params,
    )(x2, w2)
    return out2.reshape(x.shape)


if __name__ == "__main__":
    key = jax.random.PRNGKey(0)
    kx, kw, kx2, kw2, kx3, kw3, kx4, kw4 = jax.random.split(key, 8)

    # Shapes consistent with the module: NCHW input, weight = (C, H, W).
    B, C, H, W = 2, 4, 16, 16
    x = jax.random.normal(kx, (B, C, H, W), dtype=jnp.float32)

    # Module init: nn.init.zeros_(self.weight) -> sigmoid(0) = 0.5 everywhere.
    w_zeros = jnp.zeros((C, H, W), dtype=jnp.float32)
    # Non-trivial weight (as if passed via parameter_name_to_parameter).
    w_rand = jax.random.normal(kw, (C, H, W), dtype=jnp.float32)

    out_zeros = jax.block_until_ready(multiplied_layer(x, w_zeros))
    out_rand = jax.block_until_ready(multiplied_layer(x, w_rand))
    ref_zeros = x * jax.nn.sigmoid(w_zeros)[None]
    ref_rand = x * jax.nn.sigmoid(w_rand)[None]
    assert out_zeros.shape == x.shape and out_zeros.dtype == x.dtype
    assert jnp.allclose(out_zeros, ref_zeros, atol=1e-6, rtol=1e-6)
    assert jnp.allclose(out_rand, ref_rand, atol=1e-6, rtol=1e-6)

    # Ragged shape (flat = 105, not a multiple of 128): 2-D no-padding path.
    x_odd = jax.random.normal(kx2, (B, 3, 5, 7), dtype=jnp.float32)
    w_odd = jax.random.normal(kw2, (3, 5, 7), dtype=jnp.float32)
    out_odd = jax.block_until_ready(multiplied_layer(x_odd, w_odd))
    ref_odd = x_odd * jax.nn.sigmoid(w_odd)[None]
    assert out_odd.shape == x_odd.shape
    assert jnp.allclose(out_odd, ref_odd, atol=1e-6, rtol=1e-6)

    # Aligned multi-tile case (R = 300 rows -> partial last row-tile is masked).
    x_big = jax.random.normal(kx3, (B, 3, 100, 128), dtype=jnp.float32)
    w_big = jax.random.normal(kw3, (3, 100, 128), dtype=jnp.float32)
    out_big = jax.block_until_ready(multiplied_layer(x_big, w_big))
    ref_big = x_big * jax.nn.sigmoid(w_big)[None]
    assert jnp.allclose(out_big, ref_big, atol=1e-6, rtol=1e-6)

    # Ragged multi-tile case (flat = 40500 -> partial last feature-tile is masked).
    x_rg = jax.random.normal(kx4, (B, 5, 90, 90), dtype=jnp.float32)
    w_rg = jax.random.normal(kw4, (5, 90, 90), dtype=jnp.float32)
    out_rg = jax.block_until_ready(multiplied_layer(x_rg, w_rg))
    ref_rg = x_rg * jax.nn.sigmoid(w_rg)[None]
    assert jnp.allclose(out_rg, ref_rg, atol=1e-6, rtol=1e-6)

    print("KERNEL_OK")
</pallas_src>

<mosaic_0001>
module attributes {stable_mosaic.version = 11 : i64} {
  func.func @_multiplied_kernel(%arg0: i32, %arg1: i32, %arg2: memref<2x8x128xf32, #tpu.memory_space<vmem>>, %arg3: memref<8x128xf32, #tpu.memory_space<vmem>>, %arg4: memref<2x8x128xf32, #tpu.memory_space<vmem>>) attributes {dimension_semantics = [#tpu.dimension_semantics<parallel>, #tpu.dimension_semantics<parallel>], iteration_bounds = array<i64: 1, 1>, scalar_prefetch = 0 : i64, scratch_operands = 0 : i64, tpu.core_type = #tpu.core_type<tc>, window_params = [{transform_indices = @transform_0, window_bounds = array<i64: 2, 8, 128>}, {transform_indices = @transform_1, window_bounds = array<i64: 8, 128>}, {transform_indices = @transform_2, window_bounds = array<i64: 2, 8, 128>}]} {
    %c0 = arith.constant 0 : index
    %c0_0 = arith.constant 0 : index
    %0 = vector.load %arg3[%c0, %c0_0] : memref<8x128xf32, #tpu.memory_space<vmem>>, vector<8x128xf32>
    %1 = arith.negf %0 : vector<8x128xf32>
    %2 = math.exp %1 : vector<8x128xf32>
    %cst = arith.constant 1.000000e+00 : f32
    %3 = vector.broadcast %cst : f32 to vector<8x128xf32>
    %4 = arith.addf %3, %2 : vector<8x128xf32>
    %5 = arith.divf %3, %4 : vector<8x128xf32>
    %c0_1 = arith.constant 0 : index
    %c0_2 = arith.constant 0 : index
    %c0_3 = arith.constant 0 : index
    %6 = vector.load %arg2[%c0_1, %c0_2, %c0_3] : memref<2x8x128xf32, #tpu.memory_space<vmem>>, vector<2x8x128xf32>
    %7 = vector.shape_cast %5 : vector<8x128xf32> to vector<1x8x128xf32>
    %8 = vector.broadcast %7 : vector<1x8x128xf32> to vector<2x8x128xf32>
    %9 = arith.mulf %6, %8 : vector<2x8x128xf32>
    %c0_4 = arith.constant 0 : index
    %c0_5 = arith.constant 0 : index
    %c0_6 = arith.constant 0 : index
    %10 = vector.load %arg4[%c0_4, %c0_5, %c0_6] : memref<2x8x128xf32, #tpu.memory_space<vmem>>, vector<2x8x128xf32>
    tpu.vector_store %arg4[%c0_4, %c0_5, %c0_6], %9 {strides = array<i32>} : memref<2x8x128xf32, #tpu.memory_space<vmem>>, vector<2x8x128xf32>,
    return
  }
  func.func @transform_0(%arg0: i32, %arg1: i32) -> (i32, i32, i32) {
    %c0_i32 = arith.constant 0 : i32
    %c0_i32_0 = arith.constant 0 : i32
    return %arg1, %arg0, %c0_i32 : i32, i32, i32
  }
  func.func @transform_1(%arg0: i32, %arg1: i32) -> (i32, i32) {
    %c0_i32 = arith.constant 0 : i32
    %c0_i32_0 = arith.constant 0 : i32
    return %arg0, %c0_i32 : i32, i32
  }
  func.func @transform_2(%arg0: i32, %arg1: i32) -> (i32, i32, i32) {
    %c0_i32 = arith.constant 0 : i32
    %c0_i32_0 = arith.constant 0 : i32
    return %arg1, %arg0, %c0_i32 : i32, i32, i32
  }
}

</mosaic_0001>

<bundles_post_ra>
// kernel: tpu_custom_call.1
= control target key start
LH: loop header
LB: loop body
LE: loop exit
PB: predicated region body
PF: predicated region fallthrough
CT: control target
= control target key end

     0   :  { %7 = vsyncpa [#allocation3], 0  ;;  %s211_s0 = inlined_call_operand.hbm [shape: f32[2,8,128], index: 0, kind: input, shape index: {}]   ;;  %s212_s1 = inlined_call_operand.hbm [shape: f32[8,128], index: 1, kind: input, shape index: {}]   ;;  %s213_s2 = inlined_call_operand.hbm [shape: f32[2,8,128], index: 2, kind: output, shape index: {}]  }
   0x1   :  { %8 = vsyncpa [#allocation6], 0 }
   0x2   :  { %9 = vsyncpa [#allocation4], 0  ;;  %s14_s11 = sshll.u32 %s211_s0, 4  ;;  %s176_s12 = smov [#allocation2]   ;;  %s15_s11 = int_to_ptr.hbm [resolvable:$true] %s14_s11 }
   0x3   :  { %s16_s13 = sshll.u32 %s176_s12, 4  ;;  %s28_s16 = sshll.u32 %s212_s1, 4  ;;  %s17_s13 = int_to_ptr.vmem [resolvable:$true] %s16_s13  ;;  %s29_s16 = int_to_ptr.hbm [resolvable:$true] %s28_s16 }
   0x4   :  { %s177_s17 = smov 128   ;;  %s178_s18 = smov 8  }
   0x5   :  { %22 = dma.hbm_to_vmem [thread:$0]  %s15_s11, 256, %s17_s13, [#allocation3], %s177_s17, %s177_s17, %s178_s18  }
   0x6   :  { %s179_s19 = smov [#allocation5]  }
   0x7   :  { %s30_s20 = sshll.u32 %s179_s19, 4  ;;  %s31_s20 = int_to_ptr.vmem [resolvable:$true] %s30_s20 }
   0x8   :  { %33 = dma.hbm_to_vmem [thread:$0]  %s29_s16, 128, %s31_s20, [#allocation6]  }
   0x9   :  { %170 = dma.done.wait [#allocation3], 256  }
   0xa   :  { %171 = vsyncadd [#allocation3], 4294967040 }
   0xb   :  { %172 = dma.done.wait [#allocation6], 128  }
   0xc   :  { %173 = vsyncadd [#allocation6], 4294967168  ;;  %v42_v0 = vld [vmem:[#allocation5] sm:$0xff]  ;;  %v62_v12 = vld [vmem:[#allocation2] sm:$0xff]  ;;  %s180_s0 = smov [#allocation7]   ;;  %s74_s23 = sshll.u32 %s213_s2, 4  ;;  %s75_s23 = int_to_ptr.hbm [resolvable:$true] %s74_s23 }
   0xd   :  { %v88_v1 = vmul.f32 -1.442695, %v42_v0  ;;  %v63_v13 = vld [vmem:[#allocation2 + $0x8] sm:$0xff]  ;;  %s72_s1 = sshll.u32 %s180_s0, 4  ;;  %s73_s1 = int_to_ptr.vmem [resolvable:$true] %s72_s1 }
   0xf   :  { %94 = vpow2.f32 %v88_v1 }
  0x15   :  { %v95_v2 = vpop.eup %94 }
  0x16   :  { %v46_v3 = vadd.f32 1.0, %v95_v2 }
  0x18   :  { %96 = vrcp.f32 %v46_v3  ;;  %v58_v6 = vand.u32 2147483648, %v46_v3  ;;  %vm52_vm0 = vweird.f32 %v46_v3  ;;  %v56_v8 = vand.u32 2147483647, %v46_v3 }
  0x1a   :  { %v59_v10 = vor.u32 1.1754944e-38, %v58_v6  ;;  %vm57_vm3 = vcmp.eq.f32.partialorder %v56_v8, 8.507059e+37 }
  0x1e   :  { %v97_v4 = vpop.eup %96 }
  0x1f   :  { %v48_v5 = vmul.f32 %v97_v4, %v46_v3  ;;  %vm53_vm1 = vweird.f32 %v97_v4 }
  0x20   :  { %vm54_vm2 = vmor %vm52_vm0, %vm53_vm1 }
  0x21   :  { %v49_v7 = vsub.f32 1.0, %v48_v5 }
  0x23   :  { %v50_v9 = vmul.f32 %v97_v4, %v49_v7 }
  0x25   :  { %v51_v11 = vadd.f32 %v97_v4, %v50_v9 }
  0x27   :  { %v55_v14 = vsel %vm54_vm2, %v97_v4, %v51_v11 }
  0x28   :  { %v60_v15 = vsel %vm57_vm3, %v59_v10, %v55_v14 }
  0x29   :  { %v64_v16 = vmul.f32 %v62_v12, %v60_v15  ;;  %v65_v17 = vmul.f32 %v63_v13, %v60_v15 }
  0x2b   :  { %66 = vst [vmem:[#allocation7] sm:$0xff] %v64_v16 }
  0x2c   :  { %67 = vst [vmem:[#allocation7 + $0x8] sm:$0xff] %v65_v17 }
  0x2d   :  { %80 = dma.vmem_to_hbm [thread:$0]  %s73_s1, 256, %s75_s23, [#allocation4], %s177_s17, %s177_s17, %s178_s18  }
  0x2e   :  { %174 = dma.done.wait [#allocation4], 256  }
  0x2f   :  { %175 = vsyncadd [#allocation4], 4294967040 }
  0x30   :  { %85 = vsyncpa [#allocation3], 1 }
  0x31   :  { %86 = vsyncpa [#allocation6], 1 }
  0x32   :  { %87 = vsyncpa [#allocation4], 1 }

</bundles_post_ra>
